<compile_context>
chip_gen: v5e
topology: v5e:2x2
jax: 0.10.0
libtpu: 0.0.40
codegen_flags: <defaults>
</compile_context>

<pallas_src>
import functools

import jax
import jax.numpy as jnp
from jax.experimental import pallas as pl
from jax.experimental.pallas import tpu as pltpu


def _round_up(n, m):
    return ((n + m - 1) // m) * m


# ----------------------------------------------------------------------------
# Pallas kernel
# ----------------------------------------------------------------------------
def _mlp_kernel(num_hidden, *refs):
    """refs = (x_ref, w0, b0, ..., w_{nh-1}, b_{nh-1}, whT, bhT, yT_ref).

    One grid step processes a (TR, K0) tile of lane-packed batch rows.  All
    parameters are full-array, VMEM-resident blocks.  Matmuls hit the MXU
    with f32 accumulation, the sigmoid is a single EUP tanh per element.
    """
    x_ref = refs[0]
    y_ref = refs[-1]
    params = refs[1:-1]

    h = x_ref[...].astype(jnp.float32)                  # (TR, K0)
    for i in range(num_hidden):
        w = params[2 * i][...]                          # block-diag packed
        b = params[2 * i + 1][...]                      # (1, packed_width)
        h = jnp.dot(h, w, preferred_element_type=jnp.float32) + b
        # sigmoid(x) = 0.5 * tanh(0.5 * x) + 0.5  -> one EUP push per element
        h = 0.5 * jnp.tanh(0.5 * h) + 0.5

    whT = params[2 * num_hidden][...]                   # (P*4, P*H)
    bhT = params[2 * num_hidden + 1][...]               # (P*4, 1)
    # Head applied transposed (contract the lane/feature dims of both
    # operands) so the store below is lane-dense: result is (P*4, TR).
    yT = jax.lax.dot_general(
        whT, h,
        dimension_numbers=(((1,), (1,)), ((), ())),
        preferred_element_type=jnp.float32) + bhT
    y_ref[...] = yT.astype(y_ref.dtype)


# ----------------------------------------------------------------------------
# Trace-time parameter packing (block-diagonal lane packing)
# ----------------------------------------------------------------------------
def _block_diag(w, copies):
    fi, fo = w.shape
    out = jnp.zeros((copies * fi, copies * fo), w.dtype)
    for j in range(copies):
        out = out.at[j * fi:(j + 1) * fi, j * fo:(j + 1) * fo].set(w)
    return out


def _pack_params(hidden_params, head_w, head_b):
    """Expand params so P batch rows share one lane-row (done once per trace)."""
    h1 = hidden_params[0][0].shape[1]            # first hidden width (32)
    P = max(1, 128 // h1)                        # batch rows packed per lane-row
    in_dim = hidden_params[0][0].shape[0]        # NL[0] (1)
    K0 = _round_up(P * in_dim, 8)                # zero-padded first contraction

    flat = []
    for li, (w, b) in enumerate(hidden_params):
        wp = _block_diag(w, P)
        if li == 0 and wp.shape[0] != K0:
            wp = jnp.pad(wp, ((0, K0 - wp.shape[0]), (0, 0)))
        flat.extend([wp, jnp.tile(b, (1, P))])

    nh = head_w.shape[1]                         # 4 heads
    whT = _block_diag(head_w.T, P)               # (P*4, P*H)
    bhT = jnp.tile(head_b.reshape(-1, 1), (P, 1))  # (P*4, 1)
    flat.extend([whT, bhT])
    return flat, P, K0, P * nh


# ----------------------------------------------------------------------------
# Wrapper
# ----------------------------------------------------------------------------
@functools.partial(jax.jit, static_argnames=("max_rows_per_step",))
def pinn_forward_fused(x, hidden_params, head_w, head_b, *,
                       max_rows_per_step=2048):
    """PINN_1DFlowA forward; returns the fused (B, 4) slab [y1 y2 y3 y4]."""
    B, in_dim = x.shape
    num_hidden = len(hidden_params)

    flat_params, P, K0, n_out_rows = _pack_params(hidden_params, head_w, head_b)

    # ---- pack P batch rows per lane-row (pad batch only to a multiple of 8P)
    Bp = _round_up(B, 8 * P)
    if Bp != B:
        x = jnp.pad(x, ((0, Bp - B), (0, 0)))
    R = Bp // P                                   # packed rows (multiple of 8)
    xp = x.reshape(R, P * in_dim)
    if K0 != P * in_dim:
        xp = jnp.pad(xp, ((0, 0), (0, K0 - P * in_dim)))

    # ---- batch tiling: big blocks, ragged cdiv grid ------------------------
    assert max_rows_per_step % 128 == 0
    TR = R if R <= max_rows_per_step else max_rows_per_step
    n_blocks = pl.cdiv(R, TR)

    in_specs = [pl.BlockSpec((TR, K0), lambda i: (i, 0))]
    # constant block index -> params DMA'd once, VMEM-resident across steps
    in_specs += [pl.BlockSpec(p.shape, lambda i: (0, 0)) for p in flat_params]
    out_specs = pl.BlockSpec((n_out_rows, TR), lambda i: (0, i))

    yT = pl.pallas_call(
        functools.partial(_mlp_kernel, num_hidden),
        out_shape=jax.ShapeDtypeStruct((n_out_rows, R), jnp.float32),
        grid=(n_blocks,),
        in_specs=in_specs,
        out_specs=out_specs,
        compiler_params=pltpu.CompilerParams(
            dimension_semantics=("parallel",)),
    )(xp, *flat_params)

    # (P*4, R) head-major -> (B, 4) row-major: tiny transpose + reshape.
    y = yT.T.reshape(Bp, n_out_rows // P)[:B]
    return y


def pinn_forward(x, hidden_params, head_w, head_b):
    """PyTorch-compatible API: returns (y1, y2, y3, y4), each (B, 1).

    Hot paths should consume pinn_forward_fused's (B, 4) slab directly; the
    four slices below are lane-sparse XLA copies kept only for torch compat.
    """
    y = pinn_forward_fused(x, hidden_params, head_w, head_b)
    return y[:, 0:1], y[:, 1:2], y[:, 2:3], y[:, 3:4]


# ----------------------------------------------------------------------------
# Deterministic parameter init (PyTorch nn.Linear-style uniform init)
# ----------------------------------------------------------------------------
def init_params(key, NL):
    """Returns (hidden_params, head_w, head_b) matching PINN_1DFlowA(NL)."""
    hidden_params = []
    for i in range(len(NL) - 2):
        fan_in, fan_out = NL[i], NL[i + 1]
        bound = 1.0 / float(fan_in) ** 0.5
        key, kw, kb = jax.random.split(key, 3)
        w = jax.random.uniform(kw, (fan_in, fan_out), jnp.float32, -bound, bound)
        b = jax.random.uniform(kb, (1, fan_out), jnp.float32, -bound, bound)
        hidden_params.append((w, b))

    fan_in = NL[-2]
    bound = 1.0 / float(fan_in) ** 0.5
    head_ws, head_bs = [], []
    for _ in range(4):
        key, kw, kb = jax.random.split(key, 3)
        head_ws.append(
            jax.random.uniform(kw, (fan_in, 1), jnp.float32, -bound, bound))
        head_bs.append(
            jax.random.uniform(kb, (1, 1), jnp.float32, -bound, bound))
    head_w = jnp.concatenate(head_ws, axis=1)      # (NL[-2], 4)
    head_b = jnp.concatenate(head_bs, axis=1)      # (1, 4)
    return hidden_params, head_w, head_b


# Pure-JAX reference for the correctness check.
def reference_forward_fused(x, hidden_params, head_w, head_b):
    h = x
    for w, b in hidden_params:
        h = jax.nn.sigmoid(h @ w + b)
    return h @ head_w + head_b


if __name__ == "__main__":
    # NL = [in_dim, hidden, hidden, <tail entry>] as in the PyTorch script.
    NL = [1, 32, 32, 1]

    key = jax.random.PRNGKey(0)
    hidden_params, head_w, head_b = init_params(key, NL)

    ok = True

    # (a) the module's own batch_size = 10 — single-tile path.
    key, kx = jax.random.split(key)
    x_small = jax.random.uniform(kx, (10, NL[0]), jnp.float32, 0.0, 1.0)
    y1, y2, y3, y4 = pinn_forward(x_small, hidden_params, head_w, head_b)
    (y1, y2, y3, y4) = jax.block_until_ready((y1, y2, y3, y4))
    y_fused = jnp.concatenate([y1, y2, y3, y4], axis=1)
    y_ref = reference_forward_fused(x_small, hidden_params, head_w, head_b)
    ok &= all(o.shape == (10, 1) for o in (y1, y2, y3, y4))
    ok &= bool(jnp.allclose(y_fused, y_ref, atol=1e-5, rtol=1e-5))

    # (b) multi-block + ragged grid at small scale (force grid > 1 by
    #     capping the per-step packed-row count).
    key, kx = jax.random.split(key)
    x_big = jax.random.uniform(kx, (530, NL[0]), jnp.float32, 0.0, 1.0)
    y_big = pinn_forward_fused(x_big, hidden_params, head_w, head_b,
                               max_rows_per_step=128)
    y_big = jax.block_until_ready(y_big)
    y_ref_big = reference_forward_fused(x_big, hidden_params, head_w, head_b)
    ok &= (y_big.shape == (530, 4))
    ok &= bool(jnp.allclose(y_big, y_ref_big, atol=1e-5, rtol=1e-5))

    print("KERNEL_OK" if ok else "KERNEL_MISMATCH")
</pallas_src>

<mosaic_0001>
module attributes {stable_mosaic.version = 11 : i64} {
  func.func @_mlp_kernel(%arg0: i32, %arg1: memref<8x8xf32, #tpu.memory_space<vmem>>, %arg2: memref<8x128xf32, #tpu.memory_space<vmem>>, %arg3: memref<1x128xf32, #tpu.memory_space<vmem>>, %arg4: memref<128x128xf32, #tpu.memory_space<vmem>>, %arg5: memref<1x128xf32, #tpu.memory_space<vmem>>, %arg6: memref<16x128xf32, #tpu.memory_space<vmem>>, %arg7: memref<16x1xf32, #tpu.memory_space<vmem>>, %arg8: memref<16x8xf32, #tpu.memory_space<vmem>>) attributes {dimension_semantics = [#tpu.dimension_semantics<parallel>], iteration_bounds = array<i64: 1>, scalar_prefetch = 0 : i64, scratch_operands = 0 : i64, tpu.core_type = #tpu.core_type<tc>, window_params = [{transform_indices = @transform_0, window_bounds = array<i64: 8, 8>}, {pipeline_mode = #tpu.pipeline_mode<synchronous>, transform_indices = @transform_1, window_bounds = array<i64: 8, 128>}, {pipeline_mode = #tpu.pipeline_mode<synchronous>, transform_indices = @transform_2, window_bounds = array<i64: 1, 128>}, {pipeline_mode = #tpu.pipeline_mode<synchronous>, transform_indices = @transform_3, window_bounds = array<i64: 128, 128>}, {pipeline_mode = #tpu.pipeline_mode<synchronous>, transform_indices = @transform_4, window_bounds = array<i64: 1, 128>}, {pipeline_mode = #tpu.pipeline_mode<synchronous>, transform_indices = @transform_5, window_bounds = array<i64: 16, 128>}, {pipeline_mode = #tpu.pipeline_mode<synchronous>, transform_indices = @transform_6, window_bounds = array<i64: 16, 1>}, {transform_indices = @transform_7, window_bounds = array<i64: 16, 8>}]} {
    %c0 = arith.constant 0 : index
    %c0_0 = arith.constant 0 : index
    %0 = vector.load %arg1[%c0, %c0_0] : memref<8x8xf32, #tpu.memory_space<vmem>>, vector<8x8xf32>
    %c0_1 = arith.constant 0 : index
    %c0_2 = arith.constant 0 : index
    %1 = vector.load %arg2[%c0_1, %c0_2] : memref<8x128xf32, #tpu.memory_space<vmem>>, vector<8x128xf32>
    %c0_3 = arith.constant 0 : index
    %c0_4 = arith.constant 0 : index
    %2 = vector.load %arg3[%c0_3, %c0_4] : memref<1x128xf32, #tpu.memory_space<vmem>>, vector<1x128xf32>
    %cst = arith.constant dense<0.000000e+00> : vector<8x128xf32>
    %3 = tpu.matmul %0, %1, %cst {dimension_numbers = #tpu.dot_dimension_numbers<[1], [0], [0], [1], [0, 0, 1, 1], [], []>} : vector<8x8xf32>, vector<8x128xf32>, vector<8x128xf32> -> vector<8x128xf32>
    %4 = vector.broadcast %2 : vector<1x128xf32> to vector<8x128xf32>
    %5 = arith.addf %3, %4 : vector<8x128xf32>
    %cst_5 = arith.constant 5.000000e-01 : f32
    %6 = vector.broadcast %cst_5 : f32 to vector<8x128xf32>
    %7 = arith.mulf %6, %5 : vector<8x128xf32>
    %8 = math.tanh %7 : vector<8x128xf32>
    %cst_6 = arith.constant 5.000000e-01 : f32
    %9 = vector.broadcast %cst_6 : f32 to vector<8x128xf32>
    %10 = arith.mulf %9, %8 : vector<8x128xf32>
    %cst_7 = arith.constant 5.000000e-01 : f32
    %11 = vector.broadcast %cst_7 : f32 to vector<8x128xf32>
    %12 = arith.addf %10, %11 : vector<8x128xf32>
    %c0_8 = arith.constant 0 : index
    %c0_9 = arith.constant 0 : index
    %13 = vector.load %arg4[%c0_8, %c0_9] : memref<128x128xf32, #tpu.memory_space<vmem>>, vector<128x128xf32>
    %c0_10 = arith.constant 0 : index
    %c0_11 = arith.constant 0 : index
    %14 = vector.load %arg5[%c0_10, %c0_11] : memref<1x128xf32, #tpu.memory_space<vmem>>, vector<1x128xf32>
    %cst_12 = arith.constant dense<0.000000e+00> : vector<8x128xf32>
    %15 = tpu.matmul %12, %13, %cst_12 {dimension_numbers = #tpu.dot_dimension_numbers<[1], [0], [0], [1], [0, 0, 1, 1], [], []>} : vector<8x128xf32>, vector<128x128xf32>, vector<8x128xf32> -> vector<8x128xf32>
    %16 = vector.broadcast %14 : vector<1x128xf32> to vector<8x128xf32>
    %17 = arith.addf %15, %16 : vector<8x128xf32>
    %cst_13 = arith.constant 5.000000e-01 : f32
    %18 = vector.broadcast %cst_13 : f32 to vector<8x128xf32>
    %19 = arith.mulf %18, %17 : vector<8x128xf32>
    %20 = math.tanh %19 : vector<8x128xf32>
    %cst_14 = arith.constant 5.000000e-01 : f32
    %21 = vector.broadcast %cst_14 : f32 to vector<8x128xf32>
    %22 = arith.mulf %21, %20 : vector<8x128xf32>
    %cst_15 = arith.constant 5.000000e-01 : f32
    %23 = vector.broadcast %cst_15 : f32 to vector<8x128xf32>
    %24 = arith.addf %22, %23 : vector<8x128xf32>
    %c0_16 = arith.constant 0 : index
    %c0_17 = arith.constant 0 : index
    %25 = vector.load %arg6[%c0_16, %c0_17] : memref<16x128xf32, #tpu.memory_space<vmem>>, vector<16x128xf32>
    %c0_18 = arith.constant 0 : index
    %c0_19 = arith.constant 0 : index
    %26 = vector.load %arg7[%c0_18, %c0_19] : memref<16x1xf32, #tpu.memory_space<vmem>>, vector<16x1xf32>
    %cst_20 = arith.constant dense<0.000000e+00> : vector<16x8xf32>
    %27 = tpu.matmul %25, %24, %cst_20 {dimension_numbers = #tpu.dot_dimension_numbers<[1], [1], [0], [0], [0, 0, 1, 0], [], []>} : vector<16x128xf32>, vector<8x128xf32>, vector<16x8xf32> -> vector<16x8xf32>
    %28 = vector.broadcast %26 : vector<16x1xf32> to vector<16x8xf32>
    %29 = arith.addf %27, %28 : vector<16x8xf32>
    %c0_21 = arith.constant 0 : index
    %c0_22 = arith.constant 0 : index
    %30 = vector.load %arg8[%c0_21, %c0_22] : memref<16x8xf32, #tpu.memory_space<vmem>>, vector<16x8xf32>
    tpu.vector_store %arg8[%c0_21, %c0_22], %29 {strides = array<i32>} : memref<16x8xf32, #tpu.memory_space<vmem>>, vector<16x8xf32>,
    return
  }
  func.func @transform_0(%arg0: i32) -> (i32, i32) {
    %c0_i32 = arith.constant 0 : i32
    %c0_i32_0 = arith.constant 0 : i32
    return %arg0, %c0_i32 : i32, i32
  }
  func.func @transform_1(%arg0: i32) -> (i32, i32) {
    %c0_i32 = arith.constant 0 : i32
    %c0_i32_0 = arith.constant 0 : i32
    %c0_i32_1 = arith.constant 0 : i32
    return %c0_i32, %c0_i32_0 : i32, i32
  }
  func.func @transform_2(%arg0: i32) -> (i32, i32) {
    %c0_i32 = arith.constant 0 : i32
    %c0_i32_0 = arith.constant 0 : i32
    %c0_i32_1 = arith.constant 0 : i32
    return %c0_i32, %c0_i32_0 : i32, i32
  }
  func.func @transform_3(%arg0: i32) -> (i32, i32) {
    %c0_i32 = arith.constant 0 : i32
    %c0_i32_0 = arith.constant 0 : i32
    %c0_i32_1 = arith.constant 0 : i32
    return %c0_i32, %c0_i32_0 : i32, i32
  }
  func.func @transform_4(%arg0: i32) -> (i32, i32) {
    %c0_i32 = arith.constant 0 : i32
    %c0_i32_0 = arith.constant 0 : i32
    %c0_i32_1 = arith.constant 0 : i32
    return %c0_i32, %c0_i32_0 : i32, i32
  }
  func.func @transform_5(%arg0: i32) -> (i32, i32) {
    %c0_i32 = arith.constant 0 : i32
    %c0_i32_0 = arith.constant 0 : i32
    %c0_i32_1 = arith.constant 0 : i32
    return %c0_i32, %c0_i32_0 : i32, i32
  }
  func.func @transform_6(%arg0: i32) -> (i32, i32) {
    %c0_i32 = arith.constant 0 : i32
    %c0_i32_0 = arith.constant 0 : i32
    %c0_i32_1 = arith.constant 0 : i32
    return %c0_i32, %c0_i32_0 : i32, i32
  }
  func.func @transform_7(%arg0: i32) -> (i32, i32) {
    %c0_i32 = arith.constant 0 : i32
    %c0_i32_0 = arith.constant 0 : i32
    return %c0_i32, %arg0 : i32, i32
  }
}

</mosaic_0001>

<bundles_post_ra>
// kernel: pinn_forward_fused.1
= control target key start
LH: loop header
LB: loop body
LE: loop exit
PB: predicated region body
PF: predicated region fallthrough
CT: control target
= control target key end

     0   :  { %vm32_vm0 = vcmask 64512   ;;  %v156_v25 = vmov 0   ;;  %s278_s1 = inlined_call_operand.vmem [shape: f32[8,128], index: 1, kind: input, shape index: {}]   ;;  %s279_s0 = inlined_call_operand.vmem [shape: f32[8,8], index: 0, kind: input, shape index: {}]   ;;  %s280_s3 = inlined_call_operand.vmem [shape: f32[128,128], index: 3, kind: input, shape index: {}]   ;;  %s281_s2 = inlined_call_operand.vmem [shape: f32[1,128], index: 2, kind: input, shape index: {}]   ;;  %s282_s4 = inlined_call_operand.vmem [shape: f32[1,128], index: 4, kind: input, shape index: {}]   ;;  %s283_s6 = inlined_call_operand.vmem [shape: f32[16,1], index: 6, kind: input, shape index: {}]   ;;  %s284_s5 = inlined_call_operand.vmem [shape: f32[16,128], index: 5, kind: input, shape index: {}]   ;;  %s285_s7 = inlined_call_operand.vmem [shape: f32[16,8], index: 7, kind: output, shape index: {}]  }
   0x1   :  { %v27_v0 = vld [vmem:[%s278_s1] sm:$0xff]  ;;  %v75_v2 = vld [vmem:[%s280_s3 + $0x78] sm:$0xff]  ;;  %v74_v3 = vld [vmem:[%s280_s3 + $0x70] sm:$0xff]  ;;  %149 = vset.pattern.permute.xlu0 %v156_v25 }
   0x2   :  { %v26_v1 = vld [vmem:[%s279_s0] sm:$0xff]  ;;  %51 = vmatpush.msra.mxu0 %v27_v0  ;;  %80 = vmatpush.msra.mxu1 %v75_v2  ;;  %v73_v4 = vld [vmem:[%s280_s3 + $0x68] sm:$0xff]  ;;  %v71_v6 = vld [vmem:[%s280_s3 + $0x58] sm:$0xff] }
   0x3   :  { %147 = vmatmul.msk.f32.vlgmr.msra.gmra.mxu0 %vm32_vm0, %v26_v1  ;;  %v72_v5 = vld [vmem:[%s280_s3 + $0x60] sm:$0xff]  ;;  %v70_v7 = vld [vmem:[%s280_s3 + $0x50] sm:$0xff]  ;;  %v69_v8 = vld [vmem:[%s280_s3 + $0x48] sm:$0xff] }
   0x4   :  { %81 = vmatpush.msra.mxu1 %v74_v3  ;;  %v68_v9 = vld [vmem:[%s280_s3 + $0x40] sm:$0xff]  ;;  %v67_v10 = vld [vmem:[%s280_s3 + $0x38] sm:$0xff]  ;;  %v66_v11 = vld [vmem:[%s280_s3 + $0x30] sm:$0xff] }
   0x5   :  { %v65_v12 = vld [vmem:[%s280_s3 + $0x28] sm:$0xff]  ;;  %v64_v13 = vld [vmem:[%s280_s3 + $0x20] sm:$0xff]  ;;  %v63_v14 = vld [vmem:[%s280_s3 + $0x18] sm:$0xff] }
   0x6   :  { %82 = vmatpush.msra.mxu1 %v73_v4  ;;  %v62_v15 = vld [vmem:[%s280_s3 + $0x10] sm:$0xff]  ;;  %v61_v16 = vld [vmem:[%s280_s3 + $0x8] sm:$0xff]  ;;  %v60_v17 = vld [vmem:[%s280_s3] sm:$0xff] }
   0x7   :  { %v150_v18 = vld [vmem:[%s281_s2] ss:$0 sm:$0xff]  ;;  %v107_v30 = vld [vmem:[%s283_s6 + $0x8] sm:$0xff] }
   0x8   :  { %83 = vmatpush.msra.mxu1 %v72_v5  ;;  %v106_v26 = vld [vmem:[%s283_s6] sm:$0xff]  ;;  %v105_v36 = vld [vmem:[%s284_s5 + $0x8] sm:$0xff] }
   0x9   :  { %110 = vperm.xlu0 %149, %v106_v26   ;;  %v151_v27 = vld [vmem:[%s282_s4] ss:$0 sm:$0xff] }
   0xa   :  { %84 = vmatpush.msra.mxu1 %v71_v6  ;;  %v104_v35 = vld [vmem:[%s284_s5] sm:$0xff] }
   0xc   :  { %85 = vmatpush.msra.mxu1 %v70_v7 }
   0xe   :  { %86 = vmatpush.msra.mxu1 %v69_v8 }
  0x10   :  { %87 = vmatpush.msra.mxu1 %v68_v9 }
  0x11   :  { %115 = vperm.xlu0 %149, %v107_v30  }
  0x12   :  { %88 = vmatpush.msra.mxu1 %v67_v10 }
  0x14   :  { %89 = vmatpush.msra.mxu1 %v66_v11 }
  0x16   :  { %90 = vmatpush.msra.mxu1 %v65_v12 }
  0x18   :  { %91 = vmatpush.msra.mxu1 %v64_v13 }
  0x1a   :  { %92 = vmatpush.msra.mxu1 %v63_v14 }
  0x1c   :  { %93 = vmatpush.msra.mxu1 %v62_v15 }
  0x1e   :  { %94 = vmatpush.msra.mxu1 %v61_v16 }
  0x20   :  { %95 = vmatpush.msra.mxu1 %v60_v17 }
  0x7b   :  { %v111_v37 = vpop.permute.xlu0 %110 }
  0x80   :  { %v53_v19 = vpop.f32.mrf.mxu0 }
  0x81   :  { %v54_v20 = vadd.f32 %v150_v18, %v53_v19 }
  0x83   :  { %v56_v21 = vmul.f32 0.5, %v54_v20  ;;  %v116_v40 = vpop.permute.xlu0 %115 }
  0x85   :  { %152 = vtanh.f32 %v56_v21 }
  0x8b   :  { %v153_v22 = vpop.eup %152 }
  0x8c   :  { %v58_v23 = vmul.f32 0.5, %v153_v22 }
  0x8e   :  { %v59_v24 = vadd.f32 0.5, %v58_v23 }
  0x90   :  { %96 = vmatmul.f32.vlgmr.msra.gmra.mxu1 %v59_v24 }
 0x10d   :  { %v97_v28 = vpop.f32.mrf.mxu1 }
 0x10e   :  { %v98_v29 = vadd.f32 %v151_v27, %v97_v28 }
 0x110   :  { %v100_v31 = vmul.f32 0.5, %v98_v29 }
 0x112   :  { %154 = vtanh.f32 %v100_v31 }
 0x118   :  { %v155_v32 = vpop.eup %154 }
 0x119   :  { %v102_v33 = vmul.f32 0.5, %v155_v32 }
 0x11b   :  { %v103_v34 = vadd.f32 0.5, %v102_v33 }
 0x11d   :  { %133 = vmatpush.xpose.msra.mxu2 %v103_v34 }
 0x120   :  { %134 = vmatmul.f32.vlgmr.msra.gmra.mxu2 %v104_v35 }
 0x128   :  { %137 = vmatmul.f32.gmra.mxu2 %v105_v36 }
 0x1a3   :  { %v135_v38 = vpop.f32.mrf.mxu2 }
 0x1a4   :  { %v136_v39 = vadd.f32 %v135_v38, %v111_v37 }
 0x1a6   :  { %141 = vst.msk [vmem:[%s285_s7] sm:$0xff] %vm32_vm0, %v136_v39 }
 0x1ab   :  { %v138_v41 = vpop.f32.mrf.mxu2 }
 0x1ac   :  { %v139_v42 = vadd.f32 %v138_v41, %v116_v40 }
 0x1ae   :  { %142 = vst.msk [vmem:[%s285_s7 + $0x8] sm:$0xff] %vm32_vm0, %v139_v42 }

</bundles_post_ra>
